<compile_context>
chip_gen: v5e
topology: v5e:2x2
jax: 0.10.0
libtpu: 0.0.40
codegen_flags: <defaults>
</compile_context>

<pallas_src>
import numpy as np
import jax
import jax.numpy as jnp
from jax.experimental import pallas as pl
from jax.experimental.pallas import tpu as pltpu

NEG_SLOPE = 0.01  # nn.LeakyReLU default negative_slope


def _leaky(x):
    return jnp.where(x > 0, x, NEG_SLOPE * x)


def basic_block_kernel(x_ref, t1_ref, t2_ref, out_ref):
    # x_ref  : (B, S, Lin)        un-padded, un-activated input super-rows
    #                             (S = H/G, Lin = G*W*Cin, lane-dense: Lin=128)
    # t1_ref : (3*Lin, Lout)      fused banded conv1 weight, bf16
    # t2_ref : (3*Lout, Lout)     fused banded conv2 weight, bf16
    # out_ref: (B, S, Lout)       f32
    x = x_ref[...]
    B, S, _ = x.shape
    Lout = t1_ref.shape[-1]

    def conv3x3(a, t_ref):
        """3x3 / stride 1 / pad 1 conv of super-rows `a` via ONE fused matmul.

        K = 3*L: the three vertically shifted super-row slices are concatenated
        along the lane axis (im2col over the kh window); the W zero-padding and
        the (h_local, kh) tap selection are folded into the banded weights, so
        out-of-range taps simply hit zero weight columns.  Only the H halo
        (super-rows -1 and S) needs explicit zero rows, because it is
        positional and cannot be folded into a single shared weight slab.
        """
        L = a.shape[-1]
        z = jnp.zeros((B, 1, L), jnp.float32)
        ap = jnp.concatenate([z, a, z], axis=1)                      # (B, S+2, L)
        lhs = jnp.concatenate(
            [ap[:, 0:S, :], ap[:, 1:S + 1, :], ap[:, 2:S + 2, :]],
            axis=-1,
        ).reshape(B * S, 3 * L).astype(jnp.bfloat16)                 # (B*S, 3L)
        acc = jnp.dot(lhs, t_ref[...], preferred_element_type=jnp.float32)
        return acc.reshape(B, S, Lout)

    # out = conv1(leaky_relu(x)); leaky(0) == 0, so activating before padding
    # is identical to the reference's pad-inside-conv.
    o1 = conv3x3(_leaky(x), t1_ref)
    # out = conv2(leaky_relu(out)) -- intermediate kept as a value (no scratch).
    o2 = conv3x3(_leaky(o1), t2_ref)
    # out += identity (downsample is None: stride == 1 and Cin == Cout, so the
    # (h, w, c) layouts of x and o2 coincide element-for-element).
    out_ref[...] = (o2 + x).astype(out_ref.dtype)


def _pick_row_group(H, lane_c, target_lanes=128):
    """Smallest divisor G of H such that G*lane_c >= target_lanes (lane-dense)."""
    if lane_c >= target_lanes:
        return 1
    for g in range(1, H + 1):
        if H % g == 0 and g * lane_c >= target_lanes:
            return g
    return H


def _band_weights(w_oihw, W, G):
    """OIHW conv weight -> (3*G*W*Cin, G*W*Cout) fused banded slab.

    T[(j*W + wi)*Cin + ci, (ho*W + wo)*Cout + co] = w[co, ci, kh, kw]
      with kh = j - G - ho + 1 in [0,3) and kw = wi - wo + 1 in [0,3), else 0.

    `j` indexes the 3*G rows of the 3-super-row im2col window (super-rows
    s-1, s, s+1), so `rows @ T` performs the whole 3x3 conv (H/W zero padding
    expressed as missing taps / zero halo rows) for every pixel of the output
    super-row at once.  Built with exact 0/1-mask elementwise ops (no matmul)
    so weight values are copied untouched; the bf16 cast happens in the caller.
    """
    Cout, Cin, KH, KW = map(int, w_oihw.shape)
    wt = jnp.transpose(w_oihw, (2, 3, 1, 0)).astype(jnp.float32)   # (KH, KW, Cin, Cout)
    J = 3 * G
    j_idx = np.arange(J)
    ho_idx = np.arange(G)
    wi_idx = np.arange(W)
    wo_idx = np.arange(W)
    T = jnp.zeros((J, W, Cin, G, W, Cout), jnp.float32)
    for kh in range(KH):
        for kw in range(KW):
            mh = (j_idx[:, None] - G + 1 - ho_idx[None, :]) == kh        # (J, G)
            mw = (wi_idx[:, None] - wo_idx[None, :] + 1) == kw           # (W, W)
            m = (mh[:, None, :, None] & mw[None, :, None, :]).astype(np.float32)
            T = T + (jnp.asarray(m)[:, :, None, :, :, None]
                     * wt[kh, kw][None, None, :, None, None, :])
    return T.reshape(J * W * Cin, G * W * Cout)


def _vmem_capacity_bytes():
    """Physical VMEM per core (generation-aware); conservative fallback = v7x."""
    try:
        return int(getattr(pltpu.get_tpu_info(), "vmem_capacity_bytes", 64 << 20))
    except Exception:
        return 64 << 20


def _pick_batch_tile(N, S, Lin, Lout, weight_bytes, budget_bytes):
    """Largest divisor of N whose resident VMEM stays inside the budget.

    Accounting per image: 2x double-buffered input block + 2x output block
    + live in-kernel value temporaries (leaky(x), ap, im2col lhs, o1, ...)
    ~= 10 image-sized f32 slabs.  Weight slabs (double-buffered bf16) are
    subtracted from the budget up front.
    """
    per_image = 10 * S * max(Lin, Lout) * 4
    avail = max(per_image, budget_bytes - 4 * weight_bytes)
    bt = int(max(1, min(N, avail // per_image)))
    while N % bt:
        bt -= 1
    # v7x has 2 TensorCores: prefer >=2 "parallel" grid steps when splitting
    # keeps the per-step matmul M (= bt*S rows) deep enough to feed the MXU.
    if N // bt == 1 and N % 2 == 0 and (N // 2) * S >= 128:
        bt = N // 2
        while N % bt:
            bt -= 1
    return bt


def basic_block_forward(x_nchw, w1_oihw, w2_oihw):
    """PreAct BasicBlock forward (stride=1, no downsample) via a Pallas TPU kernel."""
    N, Cin, H, W = x_nchw.shape
    Cout = w1_oihw.shape[0]
    assert Cin == Cout, "residual add requires inplanes == planes (no downsample)"

    # Pack G rows per lane row so the minor dim reaches 128 lanes.
    G = _pick_row_group(H, W * Cin)
    S = H // G
    Lin = G * W * Cin
    Lout = G * W * Cout

    # NCHW -> NHWC -> (N, S, G*W*Cin): channels-minor, 2 rows folded into the
    # lane axis.  No HBM-side zero padding.
    x = jnp.transpose(x_nchw, (0, 2, 3, 1)).astype(jnp.float32).reshape(N, S, Lin)

    # Fused banded weights, shipped bf16 (MXU operands); accumulation stays f32.
    t1 = _band_weights(w1_oihw, W, G).astype(jnp.bfloat16)   # (3*Lin, Lout)
    t2 = _band_weights(w2_oihw, W, G).astype(jnp.bfloat16)   # (3*Lout, Lout)
    weight_bytes = (t1.size + t2.size) * 2

    # TODO(synk): the banded-weight formulation scales as (G*W*C)^2 per conv;
    # for production ResNet shapes switch to an im2col (tile_HW, 9*Cin) matmul
    # with an H-tiled grid + 1-row halo, sized so double-buffered in/out/im2col
    # blocks fit ~48 MiB on v7x (roughly half the H tile v5e/v6e's 128 MiB allows).
    cap = _vmem_capacity_bytes()
    vmem_limit = min(cap * 3 // 4, 96 << 20)      # ~48 MiB on v7x, ~96 MiB on v5e/v6e
    b_tile = _pick_batch_tile(N, S, Lin, Lout, weight_bytes, vmem_limit)

    # Advisory cost hint so XLA schedules the NCHW<->NHWC plumbing around us.
    m_total = N * S
    flops = 2 * m_total * (3 * Lin) * Lout + 2 * m_total * (3 * Lout) * Lout
    bytes_accessed = x.size * 4 + m_total * Lout * 4 + weight_bytes
    cost = pl.CostEstimate(flops=int(flops), transcendentals=0,
                           bytes_accessed=int(bytes_accessed))

    out = pl.pallas_call(
        basic_block_kernel,
        out_shape=jax.ShapeDtypeStruct((N, S, Lout), jnp.float32),
        grid_spec=pltpu.PrefetchScalarGridSpec(
            num_scalar_prefetch=0,
            grid=(N // b_tile,),
            in_specs=[
                pl.BlockSpec((b_tile, S, Lin), lambda b: (b, 0, 0)),
                pl.BlockSpec((3 * Lin, Lout), lambda b: (0, 0)),
                pl.BlockSpec((3 * Lout, Lout), lambda b: (0, 0)),
            ],
            out_specs=pl.BlockSpec((b_tile, S, Lout), lambda b: (b, 0, 0)),
        ),
        compiler_params=pltpu.CompilerParams(
            dimension_semantics=("parallel",),
            vmem_limit_bytes=int(vmem_limit),
        ),
        cost_estimate=cost,
    )(x, t1, t2)

    out = out.reshape(N, H, W, Cout)              # lane-dense slab -> NHWC
    return jnp.transpose(out, (0, 3, 1, 2))       # NHWC -> NCHW


def _reference(x, w1, w2):
    """Plain-JAX (f32, highest precision) reference of BasicBlock.forward."""
    def leaky(v):
        return jnp.where(v > 0, v, NEG_SLOPE * v)
    dn = jax.lax.conv_dimension_numbers(x.shape, w1.shape, ("NCHW", "OIHW", "NCHW"))
    out = leaky(x)
    out = jax.lax.conv_general_dilated(out, w1, (1, 1), ((1, 1), (1, 1)),
                                       dimension_numbers=dn,
                                       precision=jax.lax.Precision.HIGHEST)
    out = leaky(out)
    out = jax.lax.conv_general_dilated(out, w2, (1, 1), ((1, 1), (1, 1)),
                                       dimension_numbers=dn,
                                       precision=jax.lax.Precision.HIGHEST)
    return out + x


if __name__ == "__main__":
    # BasicBlock(inplanes=4, planes=4, stride=1, downsample=None)
    N, C, H, W = 2, 4, 16, 16
    key = jax.random.PRNGKey(0)
    kx, k1, k2 = jax.random.split(key, 3)
    x = jax.random.normal(kx, (N, C, H, W), jnp.float32)
    w1 = jax.random.normal(k1, (C, C, 3, 3), jnp.float32)   # torch.randn(out, in, 3, 3)
    w2 = jax.random.normal(k2, (C, C, 3, 3), jnp.float32)

    out = jax.block_until_ready(basic_block_forward(x, w1, w2))
    ref = jax.block_until_ready(_reference(x, w1, w2))
    assert out.shape == (N, C, H, W)
    # bf16 MXU operands with f32 accumulation: use a scale-relative error bound
    # (plain atol/rtol=1e-4 would reject bf16-rounded operands by design).
    err = float(jnp.max(jnp.abs(out - ref)))
    scale = float(jnp.max(jnp.abs(ref)))
    assert err <= 2e-2 * max(scale, 1.0), f"mismatch vs reference: {err} (scale {scale})"
    print("KERNEL_OK")
</pallas_src>

<mosaic_0001>
module attributes {stable_mosaic.version = 11 : i64} {
  func.func @basic_block_kernel(%arg0: i32, %arg1: memref<2x8x128xf32, #tpu.memory_space<vmem>>, %arg2: memref<384x128xbf16, #tpu.memory_space<vmem>>, %arg3: memref<384x128xbf16, #tpu.memory_space<vmem>>, %arg4: memref<2x8x128xf32, #tpu.memory_space<vmem>>) attributes {dimension_semantics = [#tpu.dimension_semantics<parallel>], iteration_bounds = array<i64: 1>, scalar_prefetch = 0 : i64, scratch_operands = 0 : i64, tpu.core_type = #tpu.core_type<tc>, window_params = [{transform_indices = @transform_0, window_bounds = array<i64: 2, 8, 128>}, {pipeline_mode = #tpu.pipeline_mode<synchronous>, transform_indices = @transform_1, window_bounds = array<i64: 384, 128>}, {pipeline_mode = #tpu.pipeline_mode<synchronous>, transform_indices = @transform_2, window_bounds = array<i64: 384, 128>}, {transform_indices = @transform_3, window_bounds = array<i64: 2, 8, 128>}]} {
    %c0 = arith.constant 0 : index
    %c0_0 = arith.constant 0 : index
    %c0_1 = arith.constant 0 : index
    %0 = vector.load %arg1[%c0, %c0_0, %c0_1] : memref<2x8x128xf32, #tpu.memory_space<vmem>>, vector<2x8x128xf32>
    %cst = arith.constant 0.000000e+00 : f32
    %1 = vector.broadcast %cst : f32 to vector<2x8x128xf32>
    %2 = arith.cmpf ogt, %0, %1 : vector<2x8x128xf32>
    %cst_2 = arith.constant 0.00999999977 : f32
    %3 = vector.broadcast %cst_2 : f32 to vector<2x8x128xf32>
    %4 = arith.mulf %3, %0 : vector<2x8x128xf32>
    %5 = arith.select %2, %0, %4 : vector<2x8x128xi1>, vector<2x8x128xf32>
    %cst_3 = arith.constant 0.000000e+00 : f32
    %6 = vector.broadcast %cst_3 : f32 to vector<2x1x128xf32>
    %7 = tpu.concatenate %6, %5, %6 in 1 : vector<2x1x128xf32>, vector<2x8x128xf32>, vector<2x1x128xf32> -> vector<2x10x128xf32>
    %8 = vector.extract_strided_slice %7 {offsets = [0, 0, 0], sizes = [2, 8, 128], strides = [1, 1, 1]} : vector<2x10x128xf32> to vector<2x8x128xf32>
    %9 = vector.extract_strided_slice %7 {offsets = [0, 1, 0], sizes = [2, 8, 128], strides = [1, 1, 1]} : vector<2x10x128xf32> to vector<2x8x128xf32>
    %10 = vector.extract_strided_slice %7 {offsets = [0, 2, 0], sizes = [2, 8, 128], strides = [1, 1, 1]} : vector<2x10x128xf32> to vector<2x8x128xf32>
    %11 = tpu.concatenate %8, %9, %10 in 2 : vector<2x8x128xf32>, vector<2x8x128xf32>, vector<2x8x128xf32> -> vector<2x8x384xf32>
    %12 = vector.shape_cast %11 : vector<2x8x384xf32> to vector<16x384xf32>
    %13 = arith.truncf %12 : vector<16x384xf32> to vector<16x384xbf16>
    %c0_4 = arith.constant 0 : index
    %c0_5 = arith.constant 0 : index
    %14 = vector.load %arg2[%c0_4, %c0_5] : memref<384x128xbf16, #tpu.memory_space<vmem>>, vector<384x128xbf16>
    %cst_6 = arith.constant dense<0.000000e+00> : vector<16x128xf32>
    %15 = tpu.matmul %13, %14, %cst_6 {dimension_numbers = #tpu.dot_dimension_numbers<[1], [0], [0], [1], [0, 0, 1, 1], [], []>} : vector<16x384xbf16>, vector<384x128xbf16>, vector<16x128xf32> -> vector<16x128xf32>
    %16 = vector.shape_cast %15 : vector<16x128xf32> to vector<2x8x128xf32>
    %cst_7 = arith.constant 0.000000e+00 : f32
    %17 = vector.broadcast %cst_7 : f32 to vector<2x8x128xf32>
    %18 = arith.cmpf ogt, %16, %17 : vector<2x8x128xf32>
    %cst_8 = arith.constant 0.00999999977 : f32
    %19 = vector.broadcast %cst_8 : f32 to vector<2x8x128xf32>
    %20 = arith.mulf %19, %16 : vector<2x8x128xf32>
    %21 = arith.select %18, %16, %20 : vector<2x8x128xi1>, vector<2x8x128xf32>
    %cst_9 = arith.constant 0.000000e+00 : f32
    %22 = vector.broadcast %cst_9 : f32 to vector<2x1x128xf32>
    %23 = tpu.concatenate %22, %21, %22 in 1 : vector<2x1x128xf32>, vector<2x8x128xf32>, vector<2x1x128xf32> -> vector<2x10x128xf32>
    %24 = vector.extract_strided_slice %23 {offsets = [0, 0, 0], sizes = [2, 8, 128], strides = [1, 1, 1]} : vector<2x10x128xf32> to vector<2x8x128xf32>
    %25 = vector.extract_strided_slice %23 {offsets = [0, 1, 0], sizes = [2, 8, 128], strides = [1, 1, 1]} : vector<2x10x128xf32> to vector<2x8x128xf32>
    %26 = vector.extract_strided_slice %23 {offsets = [0, 2, 0], sizes = [2, 8, 128], strides = [1, 1, 1]} : vector<2x10x128xf32> to vector<2x8x128xf32>
    %27 = tpu.concatenate %24, %25, %26 in 2 : vector<2x8x128xf32>, vector<2x8x128xf32>, vector<2x8x128xf32> -> vector<2x8x384xf32>
    %28 = vector.shape_cast %27 : vector<2x8x384xf32> to vector<16x384xf32>
    %29 = arith.truncf %28 : vector<16x384xf32> to vector<16x384xbf16>
    %c0_10 = arith.constant 0 : index
    %c0_11 = arith.constant 0 : index
    %30 = vector.load %arg3[%c0_10, %c0_11] : memref<384x128xbf16, #tpu.memory_space<vmem>>, vector<384x128xbf16>
    %cst_12 = arith.constant dense<0.000000e+00> : vector<16x128xf32>
    %31 = tpu.matmul %29, %30, %cst_12 {dimension_numbers = #tpu.dot_dimension_numbers<[1], [0], [0], [1], [0, 0, 1, 1], [], []>} : vector<16x384xbf16>, vector<384x128xbf16>, vector<16x128xf32> -> vector<16x128xf32>
    %32 = vector.shape_cast %31 : vector<16x128xf32> to vector<2x8x128xf32>
    %33 = arith.addf %32, %0 : vector<2x8x128xf32>
    %c0_13 = arith.constant 0 : index
    %c0_14 = arith.constant 0 : index
    %c0_15 = arith.constant 0 : index
    %34 = vector.load %arg4[%c0_13, %c0_14, %c0_15] : memref<2x8x128xf32, #tpu.memory_space<vmem>>, vector<2x8x128xf32>
    tpu.vector_store %arg4[%c0_13, %c0_14, %c0_15], %33 {strides = array<i32>} : memref<2x8x128xf32, #tpu.memory_space<vmem>>, vector<2x8x128xf32>,
    return
  }
  func.func @transform_0(%arg0: i32) -> (i32, i32, i32) {
    %c0_i32 = arith.constant 0 : i32
    %c0_i32_0 = arith.constant 0 : i32
    %c0_i32_1 = arith.constant 0 : i32
    return %arg0, %c0_i32, %c0_i32_0 : i32, i32, i32
  }
  func.func @transform_1(%arg0: i32) -> (i32, i32) {
    %c0_i32 = arith.constant 0 : i32
    %c0_i32_0 = arith.constant 0 : i32
    %c0_i32_1 = arith.constant 0 : i32
    return %c0_i32, %c0_i32_0 : i32, i32
  }
  func.func @transform_2(%arg0: i32) -> (i32, i32) {
    %c0_i32 = arith.constant 0 : i32
    %c0_i32_0 = arith.constant 0 : i32
    %c0_i32_1 = arith.constant 0 : i32
    return %c0_i32, %c0_i32_0 : i32, i32
  }
  func.func @transform_3(%arg0: i32) -> (i32, i32, i32) {
    %c0_i32 = arith.constant 0 : i32
    %c0_i32_0 = arith.constant 0 : i32
    %c0_i32_1 = arith.constant 0 : i32
    return %arg0, %c0_i32, %c0_i32_0 : i32, i32, i32
  }
}

</mosaic_0001>

<bundles_post_ra>
// kernel: tpu_custom_call.1
= control target key start
LH: loop header
LB: loop body
LE: loop exit
PB: predicated region body
PF: predicated region fallthrough
CT: control target
= control target key end

     0   :  { %8 = vsyncpa [#allocation3], 0  ;;  %s1089_s0 = inlined_call_operand.hbm [shape: f32[2,8,128], index: 0, kind: input, shape index: {}]   ;;  %s1090_s1 = inlined_call_operand.hbm [shape: bf16[384,128], index: 1, kind: input, shape index: {}]   ;;  %s1091_s2 = inlined_call_operand.hbm [shape: bf16[384,128], index: 2, kind: input, shape index: {}]   ;;  %s1092_s3 = inlined_call_operand.hbm [shape: f32[2,8,128], index: 3, kind: output, shape index: {}]  }
   0x1   :  { %9 = vsyncpa [#allocation6], 0  ;;  %s28_s14 = sshll.u32 %s1090_s1, 4  ;;  %s29_s14 = int_to_ptr.hbm [resolvable:$true] %s28_s14 }
   0x2   :  { %10 = vsyncpa [#allocation4], 0  ;;  %s997_s15 = smov [#allocation5]   ;;  %s15_s19 = sshll.u32 %s1089_s0, 4  ;;  %s16_s19 = int_to_ptr.hbm [resolvable:$true] %s15_s19 }
   0x3   :  { %s30_s16 = sshll.u32 %s997_s15, 4  ;;  %s998_s20 = smov 64   ;;  %s31_s16 = int_to_ptr.vmem [resolvable:$true] %s30_s16 }
   0x4   :  { %s999_s21 = smov 4   ;;  %s1000_s22 = smov [#allocation2]  }
   0x5   :  { %36 = dma.hbm_to_vmem [thread:$0]  %s29_s14, 3072, %s31_s16, [#allocation6], %s998_s20, %s998_s20, %s999_s21  }
   0x6   :  { %s17_s23 = sshll.u32 %s1000_s22, 4  ;;  %s1001_s24 = smov 128   ;;  %s18_s23 = int_to_ptr.vmem [resolvable:$true] %s17_s23 }
   0x7   :  { %s1002_s25 = smov 8   ;;  %s41_s27 = sshll.u32 %s1091_s2, 4  ;;  %s42_s27 = int_to_ptr.hbm [resolvable:$true] %s41_s27 }
   0x8   :  { %23 = dma.hbm_to_vmem [thread:$0]  %s16_s19, 256, %s18_s23, [#allocation3], %s1001_s24, %s1001_s24, %s1002_s25  }
   0x9   :  { %s1003_s28 = smov [#allocation7]  }
   0xa   :  { %s43_s0 = sshll.u32 %s1003_s28, 4  ;;  %s44_s0 = int_to_ptr.vmem [resolvable:$true] %s43_s0 }
   0xb   :  { %49 = dma.hbm_to_vmem [thread:$0]  %s42_s27, 3072, %s44_s0, [#allocation6], %s998_s20, %s998_s20, %s999_s21  }
   0xc   :  { %991 = dma.done.wait [#allocation3], 256  }
   0xd   :  { %992 = vsyncadd [#allocation3], 4294967040 }
   0xe   :  { %993 = dma.done.wait [#allocation6], 6144  }
   0xf   :  { %994 = vsyncadd [#allocation6], 4294961152  ;;  %v846_v0 = vld [vmem:[#allocation5 + $0x38] sm:$0xff]  ;;  %v845_v3 = vld [vmem:[#allocation5 + $0x30] sm:$0xff]  ;;  %vm76_vm2 = vcmask 1040384   ;;  %vm85_vm3 = vcmask 1046528  }
  0x10   :  { %v854_v1 = vld [vmem:[#allocation5 + $0x78] sm:$0xff]  ;;  %298 = vmatpush.bf16.msra.mxu0 %v846_v0  ;;  %v853_v4 = vld [vmem:[#allocation5 + $0x70] sm:$0xff]  ;;  %v844_v6 = vld [vmem:[#allocation5 + $0x28] sm:$0xff]  ;;  %vm94_vm4 = vcmask 1045504   ;;  %s1004_s2 = smov [#allocation8]   ;;  %s623_s5 = sshll.u32 %s1092_s3, 4  ;;  %s624_s5 = int_to_ptr.hbm [resolvable:$true] %s623_s5 }
  0x11   :  { %v862_v2 = vld [vmem:[#allocation5 + $0xb8] sm:$0xff]  ;;  %312 = vmatpush.bf16.msra.mxu1 %v854_v1  ;;  %v861_v5 = vld [vmem:[#allocation5 + $0xb0] sm:$0xff]  ;;  %v852_v7 = vld [vmem:[#allocation5 + $0x68] sm:$0xff]  ;;  %s621_s29 = sshll.u32 %s1004_s2, 4  ;;  %s622_s29 = int_to_ptr.vmem [resolvable:$true] %s621_s29 }
  0x12   :  { %326 = vmatpush.bf16.msra.mxu2 %v862_v2  ;;  %v860_v8 = vld [vmem:[#allocation5 + $0xa8] sm:$0xff]  ;;  %v1037_v9 = vld [vmem:[#allocation2] sm:$0xff]  ;;  %v1039_v10 = vld [vmem:[#allocation2 + $0x8] sm:$0xff] }
  0x13   :  { %vm64_vm0 = vcmp.gt.f32.partialorder %v1037_v9, 0.0  ;;  %vm65_vm1 = vcmp.gt.f32.partialorder %v1039_v10, 0.0  ;;  %v66_v11 = vmul.f32 0.01, %v1037_v9  ;;  %v67_v12 = vmul.f32 0.01, %v1039_v10  ;;  %vm1054_vm5 = vmneg %vm76_vm2 }
  0x14   :  { %299 = vmatpush.bf16.msra.mxu0 %v845_v3  ;;  %v843_v13 = vld [vmem:[#allocation5 + $0x20] sm:$0xff]  ;;  %v870_v15 = vld [vmem:[#allocation7 + $0x38] sm:$0xff]  ;;  %v869_v19 = vld [vmem:[#allocation7 + $0x30] sm:$0xff] }
  0x15   :  { %313 = vmatpush.bf16.msra.mxu1 %v853_v4  ;;  %v851_v14 = vld [vmem:[#allocation5 + $0x60] sm:$0xff]  ;;  %v68_v17 = vsel %vm64_vm0, %v1037_v9, %v66_v11  ;;  %v69_v18 = vsel %vm65_vm1, %v1039_v10, %v67_v12  ;;  %571 = vmatpush.bf16.msra.mxu3 %v870_v15  ;;  %v842_v20 = vld [vmem:[#allocation5 + $0x18] sm:$0xff]  ;;  %v841_v25 = vld [vmem:[#allocation5 + $0x10] sm:$0xff] }
  0x16   :  { %327 = vmatpush.bf16.msra.mxu2 %v861_v5  ;;  %v859_v16 = vld [vmem:[#allocation5 + $0xa0] sm:$0xff]  ;;  %v850_v21 = vld [vmem:[#allocation5 + $0x58] sm:$0xff]  ;;  %v72_v23 = vrot.slane %v68_v17, 7  ;;  %v73_v24 = vrot.slane %v69_v18, 7  ;;  %v849_v26 = vld [vmem:[#allocation5 + $0x50] sm:$0xff] }
  0x17   :  { %v858_v22 = vld [vmem:[#allocation5 + $0x98] sm:$0xff]  ;;  %v857_v27 = vld [vmem:[#allocation5 + $0x90] sm:$0xff]  ;;  %v840_v32 = vld [vmem:[#allocation5 + $0x8] sm:$0xff] }
  0x18   :  { %300 = vmatpush.bf16.msra.mxu0 %v844_v6  ;;  %v77_v28 = vsel %vm76_vm2, 0.0, %v72_v23  ;;  %v78_v29 = vsel %vm76_vm2, 0.0, %v73_v24  ;;  %v79_v30 = vsel %vm76_vm2, %v72_v23, 0.0  ;;  %v80_v31 = vsel %vm76_vm2, %v73_v24, 0.0  ;;  %v848_v33 = vld [vmem:[#allocation5 + $0x48] sm:$0xff]  ;;  %v839_v43 = vld [vmem:[#allocation5] sm:$0xff]  ;;  %vm735_vm6 = vmpackc.low %vm1054_vm5, %vm1054_vm5 }
  0x19   :  { %314 = vmatpush.bf16.msra.mxu1 %v852_v7  ;;  %572 = vmatpush.bf16.msra.mxu3 %v869_v19  ;;  %v86_v34 = vrot.slane %v77_v28, 1  ;;  %v87_v35 = vrot.slane %v79_v30, 1  ;;  %v89_v36 = vrot.slane %v78_v29, 1  ;;  %v90_v37 = vrot.slane %v80_v31, 1  ;;  %v856_v38 = vld [vmem:[#allocation5 + $0x88] sm:$0xff]  ;;  %v847_v44 = vld [vmem:[#allocation5 + $0x40] sm:$0xff] }
  0x1a   :  { %328 = vmatpush.bf16.msra.mxu2 %v860_v8  ;;  %v95_v39 = vrot.slane %v77_v28, 2  ;;  %v96_v40 = vrot.slane %v79_v30, 2  ;;  %v98_v41 = vrot.slane %v78_v29, 2  ;;  %v99_v42 = vrot.slane %v80_v31, 2  ;;  %v855_v47 = vld [vmem:[#allocation5 + $0x80] sm:$0xff]  ;;  %v878_v51 = vld [vmem:[#allocation7 + $0x78] sm:$0xff] }
  0x1b   :  { %v88_v45 = vsel %vm85_vm3, %v86_v34, %v87_v35  ;;  %v91_v46 = vsel %vm85_vm3, %v89_v36, %v90_v37  ;;  %v886_v52 = vld [vmem:[#allocation7 + $0xb8] sm:$0xff]  ;;  %v736_v53 = vpack.c.bf16 %v73_v24, %v72_v23  ;;  %v868_v56 = vld [vmem:[#allocation7 + $0x28] sm:$0xff]  ;;  %v877_v57 = vld [vmem:[#allocation7 + $0x70] sm:$0xff] }
  0x1c   :  { %301 = vmatpush.bf16.msra.mxu0 %v843_v13  ;;  %v97_v49 = vsel %vm94_vm4, %v95_v39, %v96_v40  ;;  %v100_v50 = vsel %vm94_vm4, %v98_v41, %v99_v42  ;;  %v104_v54 = vpack.c.bf16 %v91_v46, %v88_v45  ;;  %v885_v58 = vld [vmem:[#allocation7 + $0xb0] sm:$0xff]  ;;  %v867_v59 = vld [vmem:[#allocation7 + $0x20] sm:$0xff]  ;;  %v876_v60 = vld [vmem:[#allocation7 + $0x68] sm:$0xff] }
  0x1d   :  { %315 = vmatpush.bf16.msra.mxu1 %v851_v14  ;;  %v105_v55 = vpack.c.bf16 %v100_v50, %v97_v49  ;;  %573 = vmatpush.bf16.msra.mxu3 %v868_v56  ;;  %v884_v61 = vld [vmem:[#allocation7 + $0xa8] sm:$0xff]  ;;  %v866_v62 = vld [vmem:[#allocation7 + $0x18] sm:$0xff]  ;;  %v875_v63 = vld [vmem:[#allocation7 + $0x60] sm:$0xff] }
  0x1e   :  { %329 = vmatpush.bf16.msra.mxu2 %v859_v16  ;;  %v883_v0 = vld [vmem:[#allocation7 + $0xa0] sm:$0xff]  ;;  %v865_v1 = vld [vmem:[#allocation7 + $0x10] sm:$0xff]  ;;  %v874_v2 = vld [vmem:[#allocation7 + $0x58] sm:$0xff] }
  0x1f   :  { %v882_v3 = vld [vmem:[#allocation7 + $0x98] sm:$0xff]  ;;  %v864_v4 = vld [vmem:[#allocation7 + $0x8] sm:$0xff]  ;;  %v873_v5 = vld [vmem:[#allocation7 + $0x50] sm:$0xff] }
  0x20   :  { %302 = vmatpush.bf16.msra.mxu0 %v842_v20  ;;  %v881_v6 = vld [vmem:[#allocation7 + $0x90] sm:$0xff]  ;;  %v863_v7 = vld [vmem:[#allocation7] sm:$0xff]  ;;  %v872_v8 = vld [vmem:[#allocation7 + $0x48] sm:$0xff] }
  0x21   :  { %316 = vmatpush.bf16.msra.mxu1 %v850_v21  ;;  %574 = vmatpush.bf16.msra.mxu3 %v867_v59  ;;  %v880_v11 = vld [vmem:[#allocation7 + $0x88] sm:$0xff]  ;;  %v871_v12 = vld [vmem:[#allocation7 + $0x40] sm:$0xff] }
  0x22   :  { %330 = vmatpush.bf16.msra.mxu2 %v858_v22  ;;  %v879_v13 = vld [vmem:[#allocation7 + $0x80] sm:$0xff] }
  0x24   :  { %303 = vmatpush.bf16.msra.mxu0 %v841_v25 }
  0x25   :  { %317 = vmatpush.bf16.msra.mxu1 %v849_v26  ;;  %575 = vmatpush.bf16.msra.mxu3 %v866_v62 }
  0x26   :  { %331 = vmatpush.bf16.msra.mxu2 %v857_v27 }
  0x28   :  { %304 = vmatpush.bf16.msra.mxu0 %v840_v32 }
  0x29   :  { %318 = vmatpush.bf16.msra.mxu1 %v848_v33  ;;  %576 = vmatpush.bf16.msra.mxu3 %v865_v1 }
  0x2a   :  { %332 = vmatpush.bf16.msra.mxu2 %v856_v38 }
  0x2c   :  { %305 = vmatpush.bf16.msra.mxu0 %v839_v43 }
  0x2d   :  { %319 = vmatpush.bf16.msra.mxu1 %v847_v44  ;;  %577 = vmatpush.bf16.msra.mxu3 %v864_v4 }
  0x2e   :  { %333 = vmatpush.bf16.msra.mxu2 %v855_v47 }
  0x2f   :  { %737 = vmatmul.msk.bf16.vlgmr.msra.gmra.mxu0 %vm735_vm6, %v736_v53 }
  0x30   :  { %585 = vmatpush.bf16.msrb.mxu0 %v878_v51  ;;  %320 = vmatmul.bf16.vlgmr.msra.gmra.mxu1 %v104_v54 }
  0x31   :  { %599 = vmatpush.bf16.msrb.mxu1 %v886_v52  ;;  %334 = vmatmul.bf16.vlgmr.msra.gmra.mxu2 %v105_v55 }
  0x32   :  { %578 = vmatpush.bf16.msra.mxu3 %v863_v7 }
  0x34   :  { %586 = vmatpush.bf16.msrb.mxu0 %v877_v57 }
  0x35   :  { %600 = vmatpush.bf16.msrb.mxu1 %v885_v58 }
  0x38   :  { %587 = vmatpush.bf16.msrb.mxu0 %v876_v60 }
  0x39   :  { %601 = vmatpush.bf16.msrb.mxu1 %v884_v61 }
  0x3c   :  { %588 = vmatpush.bf16.msrb.mxu0 %v875_v63 }
  0x3d   :  { %602 = vmatpush.bf16.msrb.mxu1 %v883_v0 }
  0x40   :  { %589 = vmatpush.bf16.msrb.mxu0 %v874_v2 }
  0x41   :  { %603 = vmatpush.bf16.msrb.mxu1 %v882_v3 }
  0x44   :  { %590 = vmatpush.bf16.msrb.mxu0 %v873_v5 }
  0x45   :  { %604 = vmatpush.bf16.msrb.mxu1 %v881_v6 }
  0x48   :  { %591 = vmatpush.bf16.msrb.mxu0 %v872_v8 }
  0x49   :  { %605 = vmatpush.bf16.msrb.mxu1 %v880_v11 }
  0x4c   :  { %592 = vmatpush.bf16.msrb.mxu0 %v871_v12 }
  0x4d   :  { %606 = vmatpush.bf16.msrb.mxu1 %v879_v13 }
  0xac   :  { %v307_v14 = vpop.f32.mrf.mxu0 }
  0xad   :  { %v321_v15 = vpop.f32.mrf.mxu1 }
  0xae   :  { %v322_v16 = vadd.f32 %v321_v15, %v307_v14 }
  0xb4   :  { %v335_v17 = vpop.f32.mrf.mxu2  ;;  %v309_v20 = vpop.f32.mrf.mxu0 }
  0xb5   :  { %v336_v18 = vadd.f32 %v335_v17, %v322_v16  ;;  %v323_v21 = vpop.f32.mrf.mxu1 }
  0xb6   :  { %v324_v23 = vadd.f32 %v323_v21, %v309_v20 }
  0xb7   :  { %vm340_vm7 = vcmp.gt.f32.partialorder %v336_v18, 0.0  ;;  %v342_v19 = vmul.f32 0.01, %v336_v18 }
  0xb9   :  { %v344_v22 = vsel %vm340_vm7, %v336_v18, %v342_v19 }
  0xba   :  { %v348_v24 = vrot.slane %v344_v22, 7 }
  0xbc   :  { %v337_v25 = vpop.f32.mrf.mxu2  ;;  %v352_v28 = vsel %vm76_vm2, 0.0, %v348_v24  ;;  %v354_v29 = vsel %vm76_vm2, %v348_v24, 0.0 }
  0xbd   :  { %v338_v26 = vadd.f32 %v337_v25, %v324_v23  ;;  %v360_v32 = vrot.slane %v352_v28, 1  ;;  %v361_v33 = vrot.slane %v354_v29, 1  ;;  %v368_v34 = vrot.slane %v352_v28, 2 }
  0xbe   :  { %v369_v35 = vrot.slane %v354_v29, 2 }
  0xbf   :  { %vm341_vm8 = vcmp.gt.f32.partialorder %v338_v26, 0.0  ;;  %v343_v27 = vmul.f32 0.01, %v338_v26  ;;  %v362_v43 = vsel %vm85_vm3, %v360_v32, %v361_v33 }
  0xc0   :  { %v370_v45 = vsel %vm94_vm4, %v368_v34, %v369_v35 }
  0xc1   :  { %v345_v30 = vsel %vm341_vm8, %v338_v26, %v343_v27 }
  0xc2   :  { %v349_v31 = vrot.slane %v345_v30, 7 }
  0xc4   :  { %v353_v36 = vsel %vm76_vm2, 0.0, %v349_v31  ;;  %v355_v37 = vsel %vm76_vm2, %v349_v31, 0.0  ;;  %v837_v38 = vpack.c.bf16 %v349_v31, %v348_v24 }
  0xc5   :  { %v363_v39 = vrot.slane %v353_v36, 1  ;;  %v364_v40 = vrot.slane %v355_v37, 1  ;;  %v371_v41 = vrot.slane %v353_v36, 2  ;;  %v372_v42 = vrot.slane %v355_v37, 2 }
  0xc6   :  { %838 = vmatmul.msk.bf16.vlgmr.msra.gmra.mxu3 %vm735_vm6, %v837_v38 }
  0xc7   :  { %v365_v44 = vsel %vm85_vm3, %v363_v39, %v364_v40  ;;  %v373_v46 = vsel %vm94_vm4, %v371_v41, %v372_v42 }
  0xc8   :  { %v377_v47 = vpack.c.bf16 %v365_v44, %v362_v43  ;;  %v378_v49 = vpack.c.bf16 %v373_v46, %v370_v45 }
  0xca   :  { %593 = vmatmul.bf16.vlgmr.msrb.gmra.mxu0 %v377_v47  ;;  %607 = vmatmul.bf16.vlgmr.msrb.gmra.mxu1 %v378_v49 }
 0x147   :  { %v594_v50 = vpop.f32.mrf.mxu0  ;;  %v608_v51 = vpop.f32.mrf.mxu1 }
 0x149   :  { %v580_v52 = vpop.f32.mrf.mxu3 }
 0x14a   :  { %v595_v53 = vadd.f32 %v594_v50, %v580_v52 }
 0x14c   :  { %v609_v54 = vadd.f32 %v608_v51, %v595_v53 }
 0x14e   :  { %v613_v48 = vadd.f32 %v609_v54, %v1037_v9 }
 0x14f   :  { %v596_v55 = vpop.f32.mrf.mxu0  ;;  %v610_v58 = vpop.f32.mrf.mxu1 }
 0x150   :  { %615 = vst [vmem:[#allocation8] sm:$0xff] %v613_v48 }
 0x151   :  { %v582_v56 = vpop.f32.mrf.mxu3 }
 0x152   :  { %v597_v57 = vadd.f32 %v596_v55, %v582_v56 }
 0x154   :  { %v611_v59 = vadd.f32 %v610_v58, %v597_v57 }
 0x156   :  { %v614_v60 = vadd.f32 %v611_v59, %v1039_v10 }
 0x158   :  { %616 = vst [vmem:[#allocation8 + $0x8] sm:$0xff] %v614_v60 }
 0x159   :  { %629 = dma.vmem_to_hbm [thread:$0]  %s622_s29, 256, %s624_s5, [#allocation4], %s1001_s24, %s1001_s24, %s1002_s25  }
 0x15a   :  { %995 = dma.done.wait [#allocation4], 256  }
 0x15b   :  { %996 = vsyncadd [#allocation4], 4294967040 }
 0x15c   :  { %634 = vsyncpa [#allocation3], 1 }
 0x15d   :  { %635 = vsyncpa [#allocation6], 1 }
 0x15e   :  { %636 = vsyncpa [#allocation4], 1 }

</bundles_post_ra>
